<compile_context>
chip_gen: v7x
topology: tpu7x:2x2x1
jax: 0.10.0
libtpu: 0.0.40
codegen_flags: <defaults>
</compile_context>

<pallas_src>
import functools

import jax
import jax.numpy as jnp
from jax.experimental import pallas as pl
from jax.experimental.pallas import tpu as pltpu


def _tp_linear_kernel(tk, x_ref, w_ref, o_ref):
    """Grid = (N tiles, K tiles).  K (innermost, 'arbitrary') is the reduction
    that stands in for the TP all-reduce across shards; N ('parallel') is
    independent (and shards across both TensorCores on v7x)."""
    k = pl.program_id(1)

    @pl.when(k == 0)
    def _init():
        o_ref[...] = jnp.zeros_like(o_ref)

    # x is fully VMEM-resident (constant index_map); slice this step's K chunk
    # in place instead of re-DMAing a (B, tk) activation block per grid step.
    k_start = pl.multiple_of(k * tk, 128)
    x_tile = x_ref[:, pl.ds(k_start, tk)]

    # bf16 x bf16 -> f32 accumulation on the MXU, accumulated in place in the
    # VMEM-resident f32 output block.
    o_ref[...] += jnp.dot(x_tile, w_ref[...], preferred_element_type=jnp.float32)


def _round_up(n, m):
    return ((n + m - 1) // m) * m


def _pick_tile(dim, target):
    """Largest multiple-of-128 tile <= target that divides `dim`.  `dim` is
    always a multiple of 128 here (padded at load time), so 128 always works
    and we never fall back to an oversized full-dimension block."""
    if dim <= target:
        return dim
    t = max(128, (target // 128) * 128)
    while t > 128:
        if dim % t == 0:
            return t
        t -= 128
    return 128


def _default_w_buffers():
    """3-deep weight buffering on v5e (~820 GB/s HBM, each tile takes longer to
    land); 2 is enough elsewhere and saves VMEM on v7x (64 MiB physical)."""
    try:
        kind = jax.devices()[0].device_kind.lower()
        if "v5 lite" in kind or "v5e" in kind or "v5litepod" in kind:
            return 3
    except Exception:
        pass
    return 2


def tensor_parallel_forward(x, w_bf16, tp_degree, *, tn=2048, tk=1024,
                            w_buffers=None):
    """Emulates TensorParallelNeuronModel.forward(*tensors) -> results[0].

    x: [B, D_in] float, w_bf16: [D_in_p, D_out_p] bfloat16 weight that was
    cast/padded ONCE at load time (see TensorParallelLinear).  The weight is
    conceptually row-sharded into tp_degree K slices; the kernel's sequential
    K reduction subsumes the per-shard partials + the all-reduce, so the
    result equals results[0] (the fully reduced x @ W).
    """
    B, D_in = x.shape
    D_in_p, D_out_p = w_bf16.shape
    assert w_bf16.dtype == jnp.bfloat16
    assert D_in_p % 128 == 0 and D_out_p % 128 == 0 and D_in_p >= D_in
    # Semantic check from the TP sharding (each rank owns D_in/tp rows of W).
    assert D_in % tp_degree == 0, "D_in must shard evenly across tp_degree"

    if w_buffers is None:
        w_buffers = _default_w_buffers()

    # N tile: keep n_tiles >= 2 whenever possible so the 'parallel' axis can
    # feed both TensorCores on v7x.  K tile: large (multi-MiB weight DMAs) to
    # amortize the per-grid-step fixed cost.
    tn_target = min(tn, D_out_p // 2) if D_out_p >= 256 else D_out_p
    tn = _pick_tile(D_out_p, tn_target)
    tk = _pick_tile(D_in_p, min(tk, D_in_p))
    n_tiles = D_out_p // tn
    k_tiles = D_in_p // tk

    # Activations are tiny (B * D_in_p * 2 bytes); cast + pad here is
    # negligible HBM traffic and they stay VMEM-resident across the grid.
    x_bf = x.astype(jnp.bfloat16)
    if D_in_p != D_in:
        x_bf = jnp.pad(x_bf, ((0, 0), (0, D_in_p - D_in)))

    # VMEM budget: weight multibuffers + (double-buffered) resident x +
    # double-buffered f32 output tile.  Cap below v7x's 64 MiB physical VMEM.
    vmem_need = (w_buffers * tk * tn * 2
                 + 2 * B * D_in_p * 2
                 + 2 * B * tn * 4)
    vmem_limit = min(max(2 * vmem_need, 32 * 1024 * 1024), 56 * 1024 * 1024)

    cost = pl.CostEstimate(
        flops=2 * B * D_in_p * D_out_p,
        transcendentals=0,
        # x once (resident), W once, output written once.
        bytes_accessed=int(x_bf.size * 2 + w_bf16.size * 2 + B * D_out_p * 4),
    )

    return pl.pallas_call(
        functools.partial(_tp_linear_kernel, tk),
        out_shape=jax.ShapeDtypeStruct((B, D_out_p), jnp.float32),
        grid_spec=pltpu.PrefetchScalarGridSpec(
            num_scalar_prefetch=0,
            grid=(n_tiles, k_tiles),
            in_specs=[
                # Activations: constant block index -> single DMA, VMEM-
                # resident for the whole grid.
                pl.BlockSpec((B, D_in_p), lambda j, k: (0, 0)),
                # Weight K-slice for this step; multi-buffered so the HBM
                # weight stream (the wall clock at B=8) never stalls.
                pl.BlockSpec(
                    (tk, tn),
                    lambda j, k: (k, j),
                    pipeline_mode=pl.Buffered(w_buffers),
                ),
            ],
            # Constant over k -> VMEM-resident accumulator; "results[0]" of
            # the TP group (fully reduced output).
            out_specs=pl.BlockSpec((B, tn), lambda j, k: (0, j)),
        ),
        compiler_params=pltpu.CompilerParams(
            # N axis parallel (2 TCs on v7x), K/shard reduction sequential.
            dimension_semantics=("parallel", "arbitrary"),
            vmem_limit_bytes=vmem_limit,
        ),
        cost_estimate=cost,
    )(x_bf, w_bf16)


class TensorParallelLinear:
    """Minimal stand-in for TensorParallelNeuronModel wrapping a row-sharded
    linear layer.  Load-time work (done ONCE here, mirroring _load()): cast W
    to bf16 and pad D_in/D_out up to multiples of 128, so no per-call cast or
    pad sits on the forward hot path.  forward(x) returns results[0], the
    fully reduced x @ W."""

    def __init__(self, w, tp_degree, *, tn=2048, tk=1024, w_buffers=None):
        d_in, d_out = w.shape
        assert d_in % tp_degree == 0
        self.tp_degree = tp_degree
        self.d_out = d_out
        self.tn, self.tk, self.w_buffers = tn, tk, w_buffers
        d_in_p = _round_up(d_in, 128)
        d_out_p = _round_up(d_out, 128)
        w_bf = w.astype(jnp.bfloat16)
        if (d_in_p, d_out_p) != (d_in, d_out):
            w_bf = jnp.pad(w_bf, ((0, d_in_p - d_in), (0, d_out_p - d_out)))
        # "load": materialize the bf16 (padded) weight once, off the hot path.
        self.w_bf16 = jax.block_until_ready(w_bf)

    def __call__(self, x):
        out = tensor_parallel_forward(
            x, self.w_bf16, self.tp_degree,
            tn=self.tn, tk=self.tk, w_buffers=self.w_buffers)
        return out[:, : self.d_out]


if __name__ == "__main__":
    # Small, deterministic setup.
    tp_degree = 2          # len(models)
    B = 8                  # batch
    D_in = 256             # hidden in (2 TP shards x 128 rows)
    D_out = 256            # hidden out (2 N tiles of 128)

    key = jax.random.PRNGKey(0)
    kx, kw = jax.random.split(key)
    x = jax.random.normal(kx, (B, D_in), dtype=jnp.float32)
    w = jax.random.normal(kw, (D_in, D_out), dtype=jnp.float32) * 0.02

    # TODO(synk): the Neuron runtime collective load (_load_collectives_neuron),
    # thread-pool dispatch and move_trace_to_device have no device-kernel
    # equivalent; the in-kernel K reduction stands in for the all-reduce.

    # Small tiles (128) only for these toy shapes, so the demo exercises the
    # parallel N axis and the multi-step K reduction / weight pipeline.  Real
    # model dims should use the defaults (tk=1024, tn=2048 -> 4 MiB W DMAs).
    model = TensorParallelLinear(w, tp_degree, tn=128, tk=128)
    out = jax.block_until_ready(model(x))

    # Reference: fully reduced matmul with the same bf16 operand precision.
    ref = jnp.dot(
        x.astype(jnp.bfloat16), w.astype(jnp.bfloat16),
        preferred_element_type=jnp.float32,
    )
    assert out.shape == (B, D_out)
    assert jnp.allclose(out, ref, atol=1e-2, rtol=1e-2), "mismatch vs reference"

    print("KERNEL_OK")
</pallas_src>

<mosaic_0001>
module attributes {stable_mosaic.version = 11 : i64} {
  func.func @_tp_linear_kernel(%arg0: i32, %arg1: i32, %arg2: memref<8x256xbf16, #tpu.memory_space<vmem>>, %arg3: memref<128x128xbf16, #tpu.memory_space<vmem>>, %arg4: memref<8x128xf32, #tpu.memory_space<vmem>>) attributes {dimension_semantics = [#tpu.dimension_semantics<parallel>, #tpu.dimension_semantics<arbitrary>], iteration_bounds = array<i64: 2, 2>, scalar_prefetch = 0 : i64, scratch_operands = 0 : i64, tpu.core_type = #tpu.core_type<tc>, window_params = [{pipeline_mode = #tpu.pipeline_mode<synchronous>, transform_indices = @transform_0, window_bounds = array<i64: 8, 256>}, {pipeline_mode = #tpu.pipeline_mode<double_buffered>, transform_indices = @transform_1, window_bounds = array<i64: 128, 128>}, {transform_indices = @transform_2, window_bounds = array<i64: 8, 128>}]} {
    %c0_i32 = arith.constant 0 : i32
    %0 = arith.cmpi eq, %arg1, %c0_i32 : i32
    %1 = arith.extui %0 : i1 to i32
    %c0_i32_0 = arith.constant 0 : i32
    %2 = arith.cmpi ne, %1, %c0_i32_0 : i32
    scf.if %2 {
      %cst_7 = arith.constant 0.000000e+00 : f32
      %12 = vector.broadcast %cst_7 : f32 to vector<8x128xf32>
      %c0_8 = arith.constant 0 : index
      %c0_9 = arith.constant 0 : index
      %13 = vector.load %arg4[%c0_8, %c0_9] : memref<8x128xf32, #tpu.memory_space<vmem>>, vector<8x128xf32>
      tpu.vector_store %arg4[%c0_8, %c0_9], %12 {strides = array<i32>} : memref<8x128xf32, #tpu.memory_space<vmem>>, vector<8x128xf32>,
    } else {
    }
    %c128_i32 = arith.constant 128 : i32
    %3 = arith.muli %arg1, %c128_i32 : i32
    %4 = tpu.assume_multiple %3, 128 : i32
    %c0 = arith.constant 0 : index
    %5 = arith.index_cast %4 : i32 to index
    %6 = vector.load %arg2[%c0, %5] : memref<8x256xbf16, #tpu.memory_space<vmem>>, vector<8x128xbf16>
    %c0_1 = arith.constant 0 : index
    %c0_2 = arith.constant 0 : index
    %7 = vector.load %arg4[%c0_1, %c0_2] : memref<8x128xf32, #tpu.memory_space<vmem>>, vector<8x128xf32>
    %c0_3 = arith.constant 0 : index
    %c0_4 = arith.constant 0 : index
    %8 = vector.load %arg3[%c0_3, %c0_4] : memref<128x128xbf16, #tpu.memory_space<vmem>>, vector<128x128xbf16>
    %cst = arith.constant dense<0.000000e+00> : vector<8x128xf32>
    %9 = tpu.matmul %6, %8, %cst {dimension_numbers = #tpu.dot_dimension_numbers<[1], [0], [0], [1], [0, 0, 1, 1], [], []>} : vector<8x128xbf16>, vector<128x128xbf16>, vector<8x128xf32> -> vector<8x128xf32>
    %10 = arith.addf %7, %9 : vector<8x128xf32>
    %c0_5 = arith.constant 0 : index
    %c0_6 = arith.constant 0 : index
    %11 = vector.load %arg4[%c0_5, %c0_6] : memref<8x128xf32, #tpu.memory_space<vmem>>, vector<8x128xf32>
    tpu.vector_store %arg4[%c0_5, %c0_6], %10 {strides = array<i32>} : memref<8x128xf32, #tpu.memory_space<vmem>>, vector<8x128xf32>,
    return
  }
  func.func @transform_0(%arg0: i32, %arg1: i32) -> (i32, i32) {
    %c0_i32 = arith.constant 0 : i32
    %c0_i32_0 = arith.constant 0 : i32
    %c0_i32_1 = arith.constant 0 : i32
    return %c0_i32, %c0_i32_0 : i32, i32
  }
  func.func @transform_1(%arg0: i32, %arg1: i32) -> (i32, i32) {
    %c0_i32 = arith.constant 0 : i32
    return %arg1, %arg0 : i32, i32
  }
  func.func @transform_2(%arg0: i32, %arg1: i32) -> (i32, i32) {
    %c0_i32 = arith.constant 0 : i32
    %c0_i32_0 = arith.constant 0 : i32
    return %c0_i32, %arg0 : i32, i32
  }
}

</mosaic_0001>

<bundles_post_ra>
// kernel: tpu_custom_call.1
= control target key start
LH: loop header
LB: loop body
LE: loop exit
PB: predicated region body
PF: predicated region fallthrough
CT: control target
= control target key end

     0   :  { %s1100_s0 = inlined_call_operand.hbm [shape: bf16[8,256], index: 0, kind: input, shape index: {}]   ;;  %s1101_s1 = inlined_call_operand.hbm [shape: bf16[256,256], index: 1, kind: input, shape index: {}]   ;;  %s1102_s2 = inlined_call_operand.hbm [shape: f32[8,256], index: 2, kind: output, shape index: {}]  }
   0x1   :  { %1113 = sst [smem:[#allocation15_spill]] %s1100_s0 }
   0x2   :  { %7 = vsyncpa [#allocation3], 0 }
   0x3   :  { %8 = vsyncpa [#allocation6], 0 }
   0x4   :  { %10 = vsyncpa [#allocation6 + $0x1], 0 }
   0x5   :  { %11 = vsyncpa [#allocation4], 0 }
   0x6   :  { %13 = vsyncpa [#allocation4 + $0x1], 0  ;;  %s817_s9 = smov 0   ;;  %s819_s10 = smov 0  }
   0x7   :  { %s821_s11 = smov 0   ;;  %s823_s12 = smov 0  }
   0x8   :  { %s825_s13 = smov 0   ;;  %s827_s14 = smov 0  }
   0x9   :  { %s829_s15 = smov 0   ;;  %s831_s16 = smov 0  }
   0xa   :  { %s833_s17 = smov 0   ;;  %s835_s18 = smov 0  }
   0xb   :  { %s837_s19 = smov 0  }
   0xc LB: > { %1114 = sst [smem:[#allocation11_spill]] %s783_s17  ;;  %s422_s20 = sadd.s32 4294967295, %s791_s19   ;;  %s791_s19 = sphi %s837_s19, %s19_s19   ;;  %s787_s18 = sphi %s835_s18, %s1146_s18   ;;  %s783_s17 = sphi %s833_s17, %s1137_s17   ;;  %s779_s16 = sphi %s831_s16, %s1145_s16   ;;  %s775_s15 = sphi %s829_s15, %s1136_s15   ;;  %s771_s14 = sphi %s827_s14, %s1144_s14   ;;  %s767_s13 = sphi %s825_s13, %s1143_s13   ;;  %s763_s12 = sphi %s823_s12, %s1142_s12   ;;  %s759_s11 = sphi %s821_s11, %s1141_s11   ;;  %s755_s10 = sphi %s819_s10, %s1140_s10   ;;  %s751_s9 = sphi %s817_s9, %s1139_s9  }
   0xd   : > { %s423_s21 = sadd.s32 4294967294, %s791_s19   ;;  %p68_p0 = scmp.ne.s32.totalorder %s771_s14, %s767_s13 }
   0xe   : > { %p69_p1 = scmp.eq.s32.totalorder %s791_s19, 0  ;;  %p74_p2 = scmp.ne.s32.totalorder %s767_s13, %s763_s12 }
   0xf   : > { %p877_p3 = scmp.eq.s32.totalorder %s422_s20, 0  ;;  %p97_p5 = scmp.ne.s32.totalorder %s759_s11, %s755_s10 }
  0x10   : > { %p882_p4 = por %p69_p1, %p68_p0  ;;  %p98_p7 = scmp.eq.s32.totalorder %s422_s20, 3 }
  0x11   : > { %s1115_s23 = scalar_select %p877_p3, 1, 0 }
  0x12   : > { %p890_p6 = por %p877_p3, %p74_p2  ;;  %p103_p8 = scmp.ne.s32.totalorder %s755_s10, %s751_s9 }
  0x13   : > { %p104_p9 = scmp.eq.s32.totalorder %s423_s21, 3  ;;  %p896_p10 = por %p98_p7, %p97_p5 }
  0x14   : > { %s1117_s26 = scalar_select %p890_p6, 1, 0 }
  0x15   : > { %s1118_s27 = scalar_select %p896_p10, 1, 0 }
  0x16   : > { %p424_p11 = scmp.ge.s32.totalorder %s791_s19, 1  ;;  %p901_p12 = por %p104_p9, %p103_p8 }
  0x17   : > { %p111_p13 = scmp.lt.s32.totalorder %s791_s19, 5  ;;  %s793_s30 = smov [#allocation2]  }
  0x18   : > { %s1119_s28 = scalar_select %p901_p12, 1, 0 }
  0x19   : > { %p906_p0 = pnand %p424_p11, %p111_p13  ;;  %s124_s3 = sshll.u32 %s793_s30, 4  ;;  %s125_s3 = int_to_ptr.vmem [resolvable:$true] %s124_s3 }
  0x1a   : > { %1120 = sst [smem:[#allocation12_spill]] %s1119_s28  ;;  %p501_p2 = scmp.lt.s32.totalorder %s791_s19, 4 }
  0x1b   : > { %s1121_s29 = scalar_select %p906_p0, 1, 0 }
  0x1c   : > { %p488_p1 = pneg %p906_p0  ;;  %p921_p7 = pnand %p501_p2, %p882_p4 }
  0x1d   : > { %s1124_s0 = sld [smem:[#allocation15_spill]] }
  0x1e   : > { %p915_p5 = pnand %p488_p1, %p877_p3 }
  0x1f   : > { %s1123_s5 = scalar_select %p921_p7, 1, 0 }
  0x20   : > { %p609_p9 = pneg %p915_p5 }
  0x23   : > { %s607_s8 = scalar_lea.hbm %s1124_s0, 128 }
  0x24   : > { %p608_p8 = scmp.ne.s32.totalorder %s1124_s0, %s607_s8  ;;  %p614_p1 = scmp.lt.u32.totalorder %s607_s8, %s1124_s0 }
  0x26   : > { %p610_p11 = pnand %p609_p9, %p608_p8 }
  0x28   : > { %p611_p13 = pneg %p610_p11 }
  0x2a   : > { %p616_p4 = pnand %p614_p1, %p611_p13 }
  0x2c   : > { %619 = shalt.err (!%p616_p4)
}
  0x2d   : > { %s620_s25 = scalar_lea.vmem %s125_s3, 128  ;;  %p628_p6 = scmp.lt.s32.totalorder %s125_s3, %s125_s3 }
  0x2e   : > { %p621_p2 = scmp.ne.s32.totalorder %s125_s3, %s620_s25  ;;  %p629_p3 = scmp.lt.s32.totalorder %s620_s25, %s620_s25 }
  0x30   : > { %p623_p12 = pnand %p621_p2, %p609_p9  ;;  %p630_p0 = por %p629_p3, %p628_p6 }
  0x32   : > { %p624_p10 = pneg %p623_p12 }
  0x34   : > { %p631_p7 = pnand %p630_p0, %p624_p10 }
  0x36   : > { %634 = shalt.err (!%p631_p7)
}
  0x37   : > { %491 = dma.hbm_to_vmem [thread:$0]  (!%p915_p5), %s1124_s0, 128, %s125_s3, [#allocation3]  }
  0x38   : > { %s28_s8 = sadd.s32 1, %s783_s17  ;;  %s31_s12 = sadd.s32 1, %s787_s18 }
  0x39   : > { %p29_p12 = scmp.ge.s32.totalorder %s28_s8, 2  ;;  %s135_s20 = sand.u32 1, %s771_s14  }
  0x3a   : > { %s427_s21 = sshll.u32 %s135_s20, 6  ;;  %s450_s30 = sshll.u32 %s783_s17, 5 }
  0x3b   : > { %s1148_s8 = smov (%p29_p12, %s28_s8), 0  ;;  %s1150_s12 = smov (!%p29_p12, %s31_s12), %s787_s18 }
  0x3c   : > { %1125 = sst [smem:[#allocation13_spill]] %s1148_s8  ;;  %s56_s4 = ssub.s32 %s783_s17, %s1148_s8 }
  0x3d   : > { %p33_p3 = scmp.ge.s32.totalorder %s1150_s12, 2  ;;  %s145_s25 = sadd.s32 %s787_s18, %s450_s30 }
  0x3e   : > { %s139_s3 = scalar_lea.vmem [#allocation5], %s427_s21  ;;  %s430_s7 = sshll.u32 %s145_s25, 6 }
  0x3f   : > { %s148_s6 = sshll.u32 %s139_s3, 4  ;;  %s1152_s12 = smov (%p33_p3, %s1150_s12), 0  ;;  %s953_s6 = int_to_ptr.vmem [resolvable:$true] %s148_s6 }
  0x40   : > { %1126 = sst [smem:[#allocation14_spill]] %s1152_s12  ;;  %s57_s22 = ssub.s32 %s787_s18, %s1152_s12 }
  0x41   : > { %s960_s28 = scalar_lea.hbm %s1101_s1, %s430_s7  ;;  %s58_s30 = sor.u32 %s57_s22, %s56_s4 }
  0x42   : > { %p85_p6 = scmp.eq.s32.totalorder %s57_s22, 0  ;;  %p59_p10 = scmp.eq.s32.totalorder %s58_s30, 0 }
  0x43   : > { %s1127_s21 = sadd.s32 1, %s759_s11  ;;  %s1128_s8 = sadd.s32 1, %s771_s14 }
  0x44   : > { %s965_s3 = scalar_select %p85_p6, %s759_s11, %s1127_s21  }
  0x45   : > { %s970_s25 = scalar_select %p59_p10, %s771_s14, %s1128_s8  }
  0x46   : > { %s972_s17 = scalar_lea.sflag [#allocation6], %s135_s20  ;;  %s635_s12 = scalar_lea.hbm %s960_s28, 1024 }
  0x47   : > { %p636_p0 = scmp.ne.s32.totalorder %s960_s28, %s635_s12  ;;  %p1129_p5 = scmp.ne.s32.totalorder %s1123_s5, 0 }
  0x48   : > { %s640_s22 = scalar_lea.hbm %s1101_s1, 4096  ;;  %p641_p11 = scmp.lt.u32.totalorder %s960_s28, %s1101_s1 }
  0x49   : > { %p637_p7 = pneg %p1129_p5  ;;  %p642_p13 = scmp.lt.u32.totalorder %s640_s22, %s635_s12 }
  0x4a   : > { %p644_p4 = scmp.lt.u32.totalorder %s635_s12, %s960_s28 }
  0x4b   : > { %p638_p8 = pnand %p637_p7, %p636_p0  ;;  %p643_p1 = por %p642_p13, %p641_p11 }
  0x4d   : > { %p639_p9 = pneg %p638_p8  ;;  %p645_p2 = por %p644_p4, %p643_p1 }
  0x4f   : > { %p646_p12 = pnand %p645_p2, %p639_p9 }
  0x51   : > { %649 = shalt.err (!%p646_p12)
}
  0x52   : > { %s650_s8 = scalar_lea.vmem %s953_s6, 1024  ;;  %s794_s20 = smov [#allocation5]  }
  0x53   : > { %p651_p3 = scmp.ne.s32.totalorder %s953_s6, %s650_s8  ;;  %s655_s30 = sshll.u32 %s794_s20, 4  ;;  %s656_s30 = int_to_ptr.vmem [resolvable:$false] %s655_s30 }
  0x54   : > { %s657_s21 = scalar_lea.vmem %s656_s30, 2048  ;;  %p658_p0 = scmp.lt.s32.totalorder %s953_s6, %s656_s30 }
  0x55   : > { %p653_p6 = pnand %p651_p3, %p637_p7  ;;  %p659_p8 = scmp.lt.s32.totalorder %s657_s21, %s650_s8 }
  0x57   : > { %p654_p10 = pneg %p653_p6  ;;  %p660_p11 = por %p659_p8, %p658_p0 }
  0x59   : > { %p661_p13 = pnand %p660_p11, %p654_p10 }
  0x5b   : > { %664 = shalt.err (!%p661_p13)
}
  0x5c   : > { %s795_s12 = smov 128   ;;  %s796_s0 = smov 64  }
  0x5d   : > { %s797_s24 = smov 4   ;;  %p1130_p7 = scmp.ne.s32.totalorder %s1121_s29, 0 }
  0x5e   : > { %495 = dma.hbm_to_vmem [thread:$0]  (!%p1129_p5), %s960_s28, 1024, %s953_s6, %s972_s17, %s795_s12, %s796_s0, %s797_s24  }
  0x5f   : > { %160 = sbr.rel (%p1130_p7) target bundleno = 377 (0x179), region = 28  ;;  %p1131_p9 = scmp.ne.s32.totalorder (!%p1130_p7), %s1115_s23, 0 }
  0x66   : > { %738 = dma.done.wait (%p1131_p9), [#allocation3], 128  }
  0x67   : > { %740 = vsyncadd (%p1131_p9), [#allocation3], 4294967168  ;;  %s166_s22 = sand.u32 1, %s767_s13   ;;  %p1132_p1 = scmp.ne.s32.totalorder %s1117_s26, 0 }
  0x68   : > { %s433_s4 = sshll.u32 %s166_s22, 6  ;;  %s167_s7 = scalar_lea.sflag [#allocation6], %s166_s22 }
  0x69   : > { %s1007_s8 = scalar_lea.vmem [#allocation5], %s433_s4 }
  0x6a   : > { %742 = dma.done.wait (%p1132_p1), %s167_s7, 1024  }
  0x6b   : > { %744 = vsyncadd (%p1132_p1), %s167_s7, 4294966272  ;;  %s188_s17 = sand.u32 1, %s755_s10   ;;  %p435_p5 = scmp.ne.s32.totalorder %s775_s15, 0 }
  0x6c   : > { %s434_s28 = sshll.u32 %s188_s17, 3  ;;  %v798_v0 = vmov (!%p435_p5), 0.0  }
  0x6d   : > { %s1016_s29 = scalar_lea.vmem [#allocation7], %s434_s28  ;;  %196 = sbr.rel (%p435_p5) target bundleno = 116 (0x74), region = 40 }
  0x6e   : > { %197 = vst [vmem:[%s1016_s29] sm:$0xff] (!%p435_p5), %v798_v0 }
  0x74 PF: > { %v599_v1 = vld [vmem:[%s1007_s8] sm:$0xff]   ;;  %v799_v2 = vmov 0.0   ;;  %v600_v3 = vld [vmem:[%s1007_s8 + $0x8] sm:$0xff]   ;;  %vm800_vm0 = vmmov 0   ;;  %v601_v4 = vld [vmem:[%s1007_s8 + $0x10] sm:$0xff]   ;;  %s436_s23 = sshll.u32 %s775_s15, 7 }
  0x75   : > { %460 = vmatprep.subr.bf16.mxu0 %v799_v2  ;;  %476 = vmatprep.mubr.msk.bf16.mxu0 %vm800_vm0, %v799_v2  ;;  %v602_v5 = vld [vmem:[%s1007_s8 + $0x18] sm:$0xff]   ;;  %v603_v6 = vld [vmem:[%s1007_s8 + $0x20] sm:$0xff]   ;;  %v604_v7 = vld [vmem:[%s1007_s8 + $0x28] sm:$0xff]   ;;  %s199_s26 = sshra.s32 %s436_s23, 7  ;;  %s447_s20 = sshll.u32 %s779_s16, 7 }
  0x76   : > { %461 = vmatpush3.bf16.msra.mxu0 %v599_v1  ;;  %v605_v8 = vld [vmem:[%s1007_s8 + $0x30] sm:$0xff]   ;;  %s437_s5 = sshll.u32 %s199_s26, 2  ;;  %v606_v9 = vld [vmem:[%s1007_s8 + $0x38] sm:$0xff]   ;;  %v204_v11 = vld [vmem:[%s1016_s29] sm:$0xff]  ;;  %s325_s15 = sshll.u32 %s1016_s29, 4  ;;  %s1037_s15 = int_to_ptr.vmem [resolvable:$true] %s325_s15 }
  0x77   : > { %462 = vmatprep.subr.bf16.mxu0 %v799_v2  ;;  %s202_s6 = scalar_lea.vmem [#allocation2], %s437_s5  ;;  %s1035_s12 = scalar_lea.hbm %s1102_s2, %s447_s20 }
  0x78   : > { %v203_v10 = vld [vmem:[%s202_s6] sm:$0xf]  ;;  %s312_s0 = scalar_lea.sflag [#allocation4], %s188_s17  ;;  %s665_s16 = scalar_lea.vmem %s1037_s15, 128 }
  0x79   : > { %p666_p4 = scmp.ne.s32.totalorder %s1037_s15, %s665_s16  ;;  %p1133_p2 = scmp.ne.s32.totalorder %s1118_s27, 0 }
  0x7a   : > { %463 = vmatpush3.bf16.msra.mxu0 %v600_v3  ;;  %s801_s24 = smov [#allocation7]  }
  0x7b   : > { %464 = vmatprep.subr.bf16.mxu0 %v799_v2  ;;  %p667_p12 = pnand %p666_p4, %p1133_p2  ;;  %s669_s22 = sshll.u32 %s801_s24, 4  ;;  %s670_s22 = int_to_ptr.vmem [resolvable:$false] %s669_s22 }
  0x7c   : > { %s671_s4 = scalar_lea.vmem %s670_s22, 256  ;;  %p672_p6 = scmp.lt.s32.totalorder %s1037_s15, %s670_s22 }
  0x7d   : > { %p668_p3 = pneg %p667_p12  ;;  %p673_p10 = scmp.lt.s32.totalorder %s671_s4, %s665_s16 }
  0x7e   : > { %465 = vmatpush3.bf16.msra.mxu0 %v601_v4 }
  0x7f   : > { %466 = vmatprep.subr.bf16.mxu0 %v799_v2  ;;  %p674_p0 = por %p673_p10, %p672_p6 }
  0x81   : > { %p675_p8 = pnand %p674_p0, %p668_p3 }
  0x82   : > { %467 = vmatpush3.bf16.msra.mxu0 %v602_v5 }
  0x83   : > { %468 = vmatprep.subr.bf16.mxu0 %v799_v2 }
  0x86   : > { %469 = vmatpush3.bf16.msra.mxu0 %v603_v6 }
  0x87   : > { %470 = vmatprep.subr.bf16.mxu0 %v799_v2 }
  0x8a   : > { %471 = vmatpush3.bf16.msra.mxu0 %v604_v7 }
  0x8b   : > { %472 = vmatprep.subr.bf16.mxu0 %v799_v2 }
  0x8e   : > { %473 = vmatpush3.bf16.msra.mxu0 %v605_v8 }
  0x8f   : > { %474 = vmatprep.subr.bf16.mxu0 %v799_v2 }
  0x92   : > { %475 = vmatpush3.bf16.msra.mxu0 %v606_v9 }
  0x95   : > { %477 = vmatmul.mubr.bf16.vlgmr.msra.gmra.mrb[0].mxu0 %v203_v10 }
 0x168   : > { %v303_v12 = vpop.f32.mrb[0].mxu0 }
 0x169   : > { %v309_v13 = vadd.f32 %v303_v12, %v204_v11  ;;  %v478_v14 = vpop.f32.mrb[1].mxu0 }
 0x16a   : > { %v306_v15 = vpop.f32.mrb[2].mxu0 }
 0x16b   : > { %310 = vst [vmem:[%s1016_s29] sm:$0xff] %v309_v13  ;;  %v479_v16 = vpop.f32.mrb[3].mxu0 }
 0x16c   : > { %678 = shalt.err (!%p675_p8)
}
 0x16d   : > { %s679_s7 = scalar_lea.hbm %s1035_s12, 128  ;;  %s683_s28 = scalar_lea.hbm %s1102_s2, 256 }
 0x16e   : > { %p680_p11 = scmp.ne.s32.totalorder %s1035_s12, %s679_s7  ;;  %p684_p9 = scmp.lt.u32.totalorder %s1035_s12, %s1102_s2 }
 0x16f   : > { %p685_p1 = scmp.lt.u32.totalorder %s683_s28, %s679_s7  ;;  %p687_p4 = scmp.lt.u32.totalorder %s679_s7, %s1035_s12 }
 0x170   : > { %p681_p13 = pnand %p680_p11, %p1133_p2 }
 0x171   : > { %p686_p5 = por %p685_p1, %p684_p9 }
 0x172   : > { %p682_p7 = pneg %p681_p13 }
 0x173   : > { %p688_p12 = por %p687_p4, %p686_p5 }
 0x175   : > { %p689_p3 = pnand %p688_p12, %p682_p7 }
 0x177   : > { %692 = shalt.err (!%p689_p3)
}
 0x178   : > { %486 = dma.vmem_to_hbm [thread:$0]  (%p1133_p2), %s1037_s15, 128, %s1035_s12, %s312_s0  }
 0x179 PF: > { %s1134_s26 = sld [smem:[#allocation12_spill]]  ;;  %p503_p6 = scmp.ge.s32.totalorder %s791_s19, 2 }
 0x17a   : > { %s337_s5 = sand.u32 1, %s751_s9  }
 0x17b   : > { %s338_s6 = scalar_lea.sflag [#allocation4], %s337_s5 }
 0x17f   : > { %p1135_p10 = scmp.ne.s32.totalorder %s1134_s26, 0 }
 0x181   : > { %p497_p0 = pnand %p503_p6, %p1135_p10 }
 0x183   : > { %746 = dma.done.wait (!%p497_p0), %s338_s6, 128  }
 0x184   : > { %748 = vsyncadd (!%p497_p0), %s338_s6, 4294967168  ;;  %s19_s19 = sadd.s32 1, %s791_s19   ;;  %s1136_s15 = sld [smem:[#allocation11_spill]] }
 0x185   : > { %p16_p8 = scmp.ge.s32.totalorder %s19_s19, 6   ;;  %s1137_s17 = sld [smem:[#allocation13_spill]] }
 0x186   : > { %s1138_s27 = sld [smem:[#allocation14_spill]]  ;;  %s1139_s9 = smov %s755_s10 }
 0x187   : > { %s1140_s10 = smov %s759_s11  ;;  %s1141_s11 = smov %s965_s3 }
 0x188   : > { %s1142_s12 = smov %s767_s13  ;;  %s1143_s13 = smov %s771_s14 }
 0x189   : > { %s1144_s14 = smov %s970_s25  ;;  %s1145_s16 = smov %s787_s18 }
 0x18a   :  { %18 = sbr.rel (!%p16_p8) target bundleno = 12 (0xc), region = 83 }
 0x18c   : > { %s1146_s18 = smov %s1138_s27 }
 0x191   :  { %343 = vsyncpa [#allocation3], 1 }
 0x192   :  { %345 = vsyncpa [#allocation3 + $0x1], 1 }
 0x193   :  { %346 = vsyncpa [#allocation6], 1 }
 0x194   :  { %348 = vsyncpa [#allocation6 + $0x1], 1 }
 0x195   :  { %349 = vsyncpa [#allocation4], 1 }
 0x196   :  { %351 = vsyncpa [#allocation4 + $0x1], 1 }

</bundles_post_ra>
